<compile_context>
chip_gen: v6e
topology: v6e:2x2x1
jax: 0.10.0
libtpu: 0.0.40
codegen_flags: <defaults>
</compile_context>

<pallas_src>
import math
from functools import partial

import jax
import jax.numpy as jnp
from jax import lax
from jax.experimental import pallas as pl
from jax.experimental.pallas import tpu as pltpu


def _round_up(x, m):
    return ((x + m - 1) // m) * m


def gcn_dgi_kernel(adj_ref, seq_ref, w_ref, b_ref, alpha_ref, out_ref, acc_ref,
                   *, tk, n_valid, seq_resident, mask_last_k):
    # adj_ref  : (tm, tk)          adjacency tile, native HBM dtype (f32/bf16)
    # seq_ref  : (n_pad, F_in)     resident node features   (seq_resident=True)
    #            (tk,   F_in)      streamed K tile           (seq_resident=False)
    # w_ref    : (F_in, F_out_p)   linear weight, compute dtype, lane-padded
    # b_ref    : (1, F_out_p)      f32 bias, lane-padded
    # alpha_ref: (1, 1)            f32 PReLU slope (SMEM scalar)
    # out_ref  : (tm, F_out_p)     f32 output tile
    # acc_ref  : (tm, F_in)        f32 VMEM accumulator for adj_tile @ seq
    k = pl.program_id(1)
    nk = pl.num_programs(1)

    @pl.when(k == 0)
    def _init():
        acc_ref[...] = jnp.zeros_like(acc_ref)

    if seq_resident:
        # seq fetched into VMEM once (constant block index); slice per K step.
        seq_blk = seq_ref[pl.ds(pl.multiple_of(k * tk, tk), tk), :]
    else:
        seq_blk = seq_ref[...]

    def _accumulate(mask_cols):
        a = adj_ref[...].astype(seq_blk.dtype)   # in-kernel cast (MXU bf16 path)
        if mask_cols:
            # Zero out-of-range adjacency columns (select, so stale VMEM
            # NaN/Inf beyond N cannot leak into valid output rows).
            col = k * tk + lax.broadcasted_iota(jnp.int32, a.shape, 1)
            a = jnp.where(col < n_valid, a, jnp.zeros_like(a))
        acc_ref[...] += jnp.dot(a, seq_blk, preferred_element_type=jnp.float32)

    if mask_last_k:
        @pl.when(k == nk - 1)
        def _acc_masked():
            _accumulate(True)

        @pl.when(k < nk - 1)
        def _acc_plain():
            _accumulate(False)
    else:
        _accumulate(False)

    @pl.when(k == nk - 1)
    def _finalize():
        out = jnp.dot(acc_ref[...].astype(w_ref.dtype), w_ref[...],
                      preferred_element_type=jnp.float32)    # (tm, F_out_p)
        out = out + b_ref[...]                                # f32 bias
        a = alpha_ref[0, 0]
        out_ref[...] = jnp.where(out > 0, out, a * out).astype(out_ref.dtype)


def gcn_dgi_forward(seq, adj, weight_t, bias, alpha, *, tm=None, tk=None,
                    compute_dtype=jnp.bfloat16, seq_resident=None,
                    adj_buffers=3, vmem_limit_bytes=None):
    """seq: (1, N, F_in), adj: (N, N) [f32 or bf16 — NOT copied/cast here],
    weight_t: (F_in, F_out), bias: (F_out,), alpha: scalar PReLU slope.
    Returns (1, N, F_out) float32."""
    assert seq.shape[0] == 1
    N, f_in = seq.shape[1], seq.shape[2]
    f_out = weight_t.shape[1]
    cdt = jnp.dtype(compute_dtype)

    # ----- tile selection ----------------------------------------------------
    if tm is None:
        # >= 2 row tiles keeps both v7x TensorCores busy when the 'parallel'
        # row axis is megacore-sharded; cap at 512 for pipelining balance.
        tm = min(512, max(16, _round_up(pl.cdiv(N, 2), 16)))
    if tk is None:
        # Long K tiles -> long contiguous HBM bursts per adj row, fewer grid
        # steps (~0.35us/step).  Target ~4 MiB per adj buffer.
        tk_cap = 4096 if adj.dtype.itemsize <= 2 else 2048
        tk = min(tk_cap, _round_up(N, 128))
    assert tm % 16 == 0, "tm must be a multiple of 16 (bf16 sublane packing)"
    assert tk % 128 == 0, "tk must be a multiple of 128 (lane width)"

    n_k = pl.cdiv(N, tk)
    n_pad = n_k * tk
    mask_last_k = (n_pad != N)        # handled in-kernel; adj is never padded

    # ----- operand preparation (tiny arrays only; adj untouched) -------------
    seq2d = seq[0].astype(compute_dtype)                # (N, F_in)
    if n_pad != N:
        seq2d = jnp.pad(seq2d, ((0, n_pad - N), (0, 0)))   # ~N*F_in bytes, cheap

    # Lane-dense output: pad F_out to a multiple of 128 with zero weight
    # columns / zero bias (PReLU(0)=0); slice the pad off afterwards.
    f_out_p = _round_up(f_out, 128)
    w_p = weight_t.astype(compute_dtype)                # bf16 MXU finalize path
    b_p = bias.astype(jnp.float32).reshape(1, f_out)
    if f_out_p != f_out:
        w_p = jnp.pad(w_p, ((0, 0), (0, f_out_p - f_out)))
        b_p = jnp.pad(b_p, ((0, 0), (0, f_out_p - f_out)))
    alpha2d = jnp.asarray(alpha, jnp.float32).reshape(1, 1)

    if seq_resident is None:
        seq_resident = (n_pad * f_in * cdt.itemsize) <= (8 << 20)

    # ----- VMEM budget (raise v5e's 16 MiB scoped default when needed) -------
    need = (adj_buffers * tm * tk * adj.dtype.itemsize
            + (n_pad if seq_resident else 2 * tk) * f_in * cdt.itemsize
            + 2 * f_in * f_out_p * cdt.itemsize
            + 2 * f_out_p * 4
            + 2 * tm * f_out_p * 4
            + tm * f_in * 4)
    if vmem_limit_bytes is None and need > (12 << 20):
        vmem_limit_bytes = min(64 << 20, int(need * 1.3) + (4 << 20))

    kernel = partial(gcn_dgi_kernel, tk=tk, n_valid=N,
                     seq_resident=seq_resident, mask_last_k=mask_last_k)
    seq_spec = (pl.BlockSpec((n_pad, f_in), lambda i, k: (0, 0)) if seq_resident
                else pl.BlockSpec((tk, f_in), lambda i, k: (k, 0)))

    def build(n_adj_buf):
        if n_adj_buf == 2:
            adj_spec = pl.BlockSpec((tm, tk), lambda i, k: (i, k))
        else:
            adj_spec = pl.BlockSpec((tm, tk), lambda i, k: (i, k),
                                    pipeline_mode=pl.Buffered(n_adj_buf))
        return pl.pallas_call(
            kernel,
            out_shape=jax.ShapeDtypeStruct((N, f_out_p), jnp.float32),
            grid_spec=pltpu.PrefetchScalarGridSpec(
                num_scalar_prefetch=0,
                grid=(pl.cdiv(N, tm), n_k),
                in_specs=[
                    adj_spec,                                          # adj tile
                    seq_spec,                                          # seq
                    pl.BlockSpec((f_in, f_out_p), lambda i, k: (0, 0)),  # weight
                    pl.BlockSpec((1, f_out_p), lambda i, k: (0, 0)),     # bias
                    pl.BlockSpec(memory_space=pltpu.SMEM),               # alpha
                ],
                out_specs=pl.BlockSpec((tm, f_out_p), lambda i, k: (i, 0)),
                scratch_shapes=[pltpu.VMEM((tm, f_in), jnp.float32)],
            ),
            compiler_params=pltpu.CompilerParams(
                dimension_semantics=("parallel", "arbitrary"),
                vmem_limit_bytes=vmem_limit_bytes,
            ),
        )

    try:
        out2d = build(adj_buffers)(adj, seq2d, w_p, b_p, alpha2d)
    except Exception:
        # Fallback if Buffered(n>2) pipelining is rejected by this JAX build.
        if adj_buffers == 2:
            raise
        out2d = build(2)(adj, seq2d, w_p, b_p, alpha2d)

    if f_out_p != f_out:
        out2d = out2d[:, :f_out]
    return out2d[None, :, :]                              # unsqueeze(0)


def xavier_uniform(key, shape):
    # matches torch.nn.init.xavier_uniform_ for a Linear weight (out_ft, in_ft)
    fan_out, fan_in = shape
    limit = math.sqrt(6.0 / (fan_in + fan_out))
    return jax.random.uniform(key, shape, jnp.float32, -limit, limit)


def _reference(seq, adj, weight_t, bias, alpha):
    seq_fts = seq[0].astype(jnp.float32) @ weight_t.astype(jnp.float32)
    ref = adj.astype(jnp.float32) @ seq_fts + bias
    return jnp.where(ref > 0, ref, alpha * ref)[None]


def _make_graph(key, n, f_in):
    ks, ka = jax.random.split(key)
    seq = jax.random.normal(ks, (1, n, f_in), jnp.float32)
    adj = jax.random.uniform(ka, (n, n), jnp.float32)
    adj = adj / jnp.sum(adj, axis=-1, keepdims=True)   # row-normalized dense adj
    return seq, adj


if __name__ == "__main__":
    key = jax.random.PRNGKey(0)
    k_w, k1, k2, k3 = jax.random.split(key, 4)

    in_ft, out_ft = 32, 64
    alpha = jnp.float32(0.25)                       # nn.PReLU default slope
    bias = jnp.zeros((out_ft,), jnp.float32)        # bias.fill_(0.0)
    w = xavier_uniform(k_w, (out_ft, in_ft))        # torch Linear weight layout
    weight_t = w.T                                  # (in_ft, out_ft) for kernel

    # bf16 compute with f32 accumulation -> loose tolerance vs. f32 reference.
    TOL = dict(atol=1e-2, rtol=1e-2)

    # --- case 1: defaults (2 row tiles -> megacore friendly, single K step) ---
    N = 128
    seq, adj = _make_graph(k1, N, in_ft)
    out = jax.block_until_ready(gcn_dgi_forward(seq, adj, weight_t, bias, alpha))
    ref = _reference(seq, adj, weight_t, bias, alpha)
    assert out.shape == (1, N, out_ft)
    assert jnp.allclose(out, ref, **TOL), "case 1 (defaults) mismatch"

    # --- case 2: 3x3 grid, f32 accumulator across K, resident seq -------------
    N = 384
    seq, adj = _make_graph(k2, N, in_ft)
    out = jax.block_until_ready(
        gcn_dgi_forward(seq, adj, weight_t, bias, alpha, tm=128, tk=128))
    ref = _reference(seq, adj, weight_t, bias, alpha)
    assert out.shape == (1, N, out_ft)
    assert jnp.allclose(out, ref, **TOL), "case 2 (tiled) mismatch"

    # --- case 3: ragged N (partial row tiles + in-kernel last-K column mask) --
    N = 200
    seq, adj = _make_graph(k3, N, in_ft)
    out = jax.block_until_ready(
        gcn_dgi_forward(seq, adj, weight_t, bias, alpha, tm=64, tk=128))
    ref = _reference(seq, adj, weight_t, bias, alpha)
    assert out.shape == (1, N, out_ft)
    assert jnp.allclose(out, ref, **TOL), "case 3 (ragged) mismatch"

    # --- case 4: streamed-seq fallback path (seq_resident=False) --------------
    N = 384
    seq, adj = _make_graph(k2, N, in_ft)
    out = jax.block_until_ready(
        gcn_dgi_forward(seq, adj, weight_t, bias, alpha, tm=128, tk=128,
                        seq_resident=False))
    ref = _reference(seq, adj, weight_t, bias, alpha)
    assert jnp.allclose(out, ref, **TOL), "case 4 (streamed seq) mismatch"

    print("KERNEL_OK")
</pallas_src>

<mosaic_0001>
module attributes {stable_mosaic.version = 11 : i64} {
  func.func @gcn_dgi_kernel(%arg0: i32, %arg1: i32, %arg2: memref<64x128xf32, #tpu.memory_space<vmem>>, %arg3: memref<128x32xbf16, #tpu.memory_space<vmem>>, %arg4: memref<32x128xbf16, #tpu.memory_space<vmem>>, %arg5: memref<1x128xf32, #tpu.memory_space<vmem>>, %arg6: memref<1x1xf32, #tpu.memory_space<smem>>, %arg7: memref<64x128xf32, #tpu.memory_space<vmem>>, %arg8: memref<64x32xf32, #tpu.memory_space<vmem>>) attributes {dimension_semantics = [#tpu.dimension_semantics<parallel>, #tpu.dimension_semantics<arbitrary>], iteration_bounds = array<i64: 2, 1>, scalar_prefetch = 0 : i64, scratch_operands = 1 : i64, tpu.core_type = #tpu.core_type<tc>, window_params = [{transform_indices = @transform_0, window_bounds = array<i64: 64, 128>}, {pipeline_mode = #tpu.pipeline_mode<synchronous>, transform_indices = @transform_1, window_bounds = array<i64: 128, 32>}, {pipeline_mode = #tpu.pipeline_mode<synchronous>, transform_indices = @transform_2, window_bounds = array<i64: 32, 128>}, {pipeline_mode = #tpu.pipeline_mode<synchronous>, transform_indices = @transform_3, window_bounds = array<i64: 1, 128>}, {transform_indices = @transform_4, window_bounds = array<i64: 1, 1>}, {transform_indices = @transform_5, window_bounds = array<i64: 64, 128>}]} {
    %c0_i32 = arith.constant 0 : i32
    %0 = arith.cmpi eq, %arg1, %c0_i32 : i32
    %1 = arith.extui %0 : i1 to i32
    %c0_i32_0 = arith.constant 0 : i32
    %2 = arith.cmpi ne, %1, %c0_i32_0 : i32
    scf.if %2 {
      %cst_9 = arith.constant 0.000000e+00 : f32
      %16 = vector.broadcast %cst_9 : f32 to vector<64x32xf32>
      %c0_10 = arith.constant 0 : index
      %c0_11 = arith.constant 0 : index
      %17 = vector.load %arg8[%c0_10, %c0_11] : memref<64x32xf32, #tpu.memory_space<vmem>>, vector<64x32xf32>
      tpu.vector_store %arg8[%c0_10, %c0_11], %16 {strides = array<i32>} : memref<64x32xf32, #tpu.memory_space<vmem>>, vector<64x32xf32>,
    } else {
    }
    %c128_i32 = arith.constant 128 : i32
    %3 = arith.muli %arg1, %c128_i32 : i32
    %4 = tpu.assume_multiple %3, 128 : i32
    %5 = arith.index_cast %4 : i32 to index
    %c0 = arith.constant 0 : index
    %6 = vector.load %arg3[%5, %c0] : memref<128x32xbf16, #tpu.memory_space<vmem>>, vector<128x32xbf16>
    %c0_1 = arith.constant 0 : index
    %c0_2 = arith.constant 0 : index
    %7 = vector.load %arg2[%c0_1, %c0_2] : memref<64x128xf32, #tpu.memory_space<vmem>>, vector<64x128xf32>
    %8 = arith.truncf %7 : vector<64x128xf32> to vector<64x128xbf16>
    %c0_3 = arith.constant 0 : index
    %c0_4 = arith.constant 0 : index
    %9 = vector.load %arg8[%c0_3, %c0_4] : memref<64x32xf32, #tpu.memory_space<vmem>>, vector<64x32xf32>
    %cst = arith.constant dense<0.000000e+00> : vector<64x32xf32>
    %10 = tpu.matmul %8, %6, %cst {dimension_numbers = #tpu.dot_dimension_numbers<[1], [0], [0], [1], [0, 0, 1, 1], [], []>} : vector<64x128xbf16>, vector<128x32xbf16>, vector<64x32xf32> -> vector<64x32xf32>
    %11 = arith.addf %9, %10 : vector<64x32xf32>
    %c0_5 = arith.constant 0 : index
    %c0_6 = arith.constant 0 : index
    %12 = vector.load %arg8[%c0_5, %c0_6] : memref<64x32xf32, #tpu.memory_space<vmem>>, vector<64x32xf32>
    tpu.vector_store %arg8[%c0_5, %c0_6], %11 {strides = array<i32>} : memref<64x32xf32, #tpu.memory_space<vmem>>, vector<64x32xf32>,
    %c0_i32_7 = arith.constant 0 : i32
    %13 = arith.cmpi eq, %arg1, %c0_i32_7 : i32
    %14 = arith.extui %13 : i1 to i32
    %c0_i32_8 = arith.constant 0 : i32
    %15 = arith.cmpi ne, %14, %c0_i32_8 : i32
    scf.if %15 {
      %c0_9 = arith.constant 0 : index
      %c0_10 = arith.constant 0 : index
      %16 = vector.load %arg8[%c0_9, %c0_10] : memref<64x32xf32, #tpu.memory_space<vmem>>, vector<64x32xf32>
      %17 = arith.truncf %16 : vector<64x32xf32> to vector<64x32xbf16>
      %c0_11 = arith.constant 0 : index
      %c0_12 = arith.constant 0 : index
      %18 = vector.load %arg4[%c0_11, %c0_12] : memref<32x128xbf16, #tpu.memory_space<vmem>>, vector<32x128xbf16>
      %cst_13 = arith.constant dense<0.000000e+00> : vector<64x128xf32>
      %19 = tpu.matmul %17, %18, %cst_13 {dimension_numbers = #tpu.dot_dimension_numbers<[1], [0], [0], [1], [0, 0, 1, 1], [], []>} : vector<64x32xbf16>, vector<32x128xbf16>, vector<64x128xf32> -> vector<64x128xf32>
      %c0_14 = arith.constant 0 : index
      %c0_15 = arith.constant 0 : index
      %20 = vector.load %arg5[%c0_14, %c0_15] : memref<1x128xf32, #tpu.memory_space<vmem>>, vector<1x128xf32>
      %21 = vector.broadcast %20 : vector<1x128xf32> to vector<64x128xf32>
      %22 = arith.addf %19, %21 : vector<64x128xf32>
      %c0_16 = arith.constant 0 : index
      %c0_17 = arith.constant 0 : index
      %23 = memref.load %arg6[%c0_16, %c0_17] : memref<1x1xf32, #tpu.memory_space<smem>>
      %cst_18 = arith.constant 0.000000e+00 : f32
      %24 = vector.broadcast %cst_18 : f32 to vector<64x128xf32>
      %25 = arith.cmpf ogt, %22, %24 : vector<64x128xf32>
      %26 = vector.broadcast %23 : f32 to vector<64x128xf32>
      %27 = arith.mulf %26, %22 : vector<64x128xf32>
      %28 = arith.select %25, %22, %27 : vector<64x128xi1>, vector<64x128xf32>
      %c0_19 = arith.constant 0 : index
      %c0_20 = arith.constant 0 : index
      %29 = vector.load %arg7[%c0_19, %c0_20] : memref<64x128xf32, #tpu.memory_space<vmem>>, vector<64x128xf32>
      tpu.vector_store %arg7[%c0_19, %c0_20], %28 {strides = array<i32>} : memref<64x128xf32, #tpu.memory_space<vmem>>, vector<64x128xf32>,
    } else {
    }
    return
  }
  func.func @transform_0(%arg0: i32, %arg1: i32) -> (i32, i32) {
    %c0_i32 = arith.constant 0 : i32
    return %arg0, %arg1 : i32, i32
  }
  func.func @transform_1(%arg0: i32, %arg1: i32) -> (i32, i32) {
    %c0_i32 = arith.constant 0 : i32
    %c0_i32_0 = arith.constant 0 : i32
    %c0_i32_1 = arith.constant 0 : i32
    return %c0_i32, %c0_i32_0 : i32, i32
  }
  func.func @transform_2(%arg0: i32, %arg1: i32) -> (i32, i32) {
    %c0_i32 = arith.constant 0 : i32
    %c0_i32_0 = arith.constant 0 : i32
    %c0_i32_1 = arith.constant 0 : i32
    return %c0_i32, %c0_i32_0 : i32, i32
  }
  func.func @transform_3(%arg0: i32, %arg1: i32) -> (i32, i32) {
    %c0_i32 = arith.constant 0 : i32
    %c0_i32_0 = arith.constant 0 : i32
    %c0_i32_1 = arith.constant 0 : i32
    return %c0_i32, %c0_i32_0 : i32, i32
  }
  func.func @transform_4(%arg0: i32, %arg1: i32) -> (i32, i32) {
    %c0_i32 = arith.constant 0 : i32
    %c0_i32_0 = arith.constant 0 : i32
    %c0_i32_1 = arith.constant 0 : i32
    return %c0_i32, %c0_i32_0 : i32, i32
  }
  func.func @transform_5(%arg0: i32, %arg1: i32) -> (i32, i32) {
    %c0_i32 = arith.constant 0 : i32
    %c0_i32_0 = arith.constant 0 : i32
    return %arg0, %c0_i32 : i32, i32
  }
}

</mosaic_0001>

<bundles_post_ra>
// kernel: tpu_custom_call.1
= control target key start
LH: loop header
LB: loop body
LE: loop exit
PB: predicated region body
PF: predicated region fallthrough
CT: control target
= control target key end

     0   :  { %s1231_s0 = inlined_call_operand.hbm [shape: f32[128,128], index: 0, kind: input, shape index: {}]   ;;  %s1232_s1 = inlined_call_operand.vmem [shape: bf16[128,32], index: 1, kind: input, shape index: {}]   ;;  %s1233_s2 = inlined_call_operand.vmem [shape: bf16[32,128], index: 2, kind: input, shape index: {}]   ;;  %s1234_s3 = inlined_call_operand.vmem [shape: f32[1,128], index: 3, kind: input, shape index: {}]   ;;  %s1235_s4 = inlined_call_operand.<no memory space> [shape: f32[1,1], index: 4, kind: input, shape index: {}]   ;;  %s1236_s5 = inlined_call_operand.hbm [shape: f32[128,128], index: 5, kind: output, shape index: {}]  }
   0x1   :  { %10 = sst [smem:[#allocation3]] %s1235_s4 }
   0x2   :  { %11 = vsyncpa [#allocation5], 0 }
   0x3   :  { %13 = vsyncpa [#allocation5 + $0x1], 0 }
   0x4   :  { %14 = vsyncpa [#allocation6], 0 }
   0x5   :  { %16 = vsyncpa [#allocation6 + $0x1], 0  ;;  %s1007_s20 = smov 0   ;;  %s1009_s21 = smov 0  }
   0x6   :  { %s1011_s22 = smov 0   ;;  %s1013_s23 = smov 0  }
   0x7   :  { %s1015_s24 = smov 0   ;;  %s1017_s25 = smov 0  }
   0x8 LB: > { %s694_s4 = sadd.s32 4294967295, %s965_s25   ;;  %s695_s26 = sadd.s32 4294967294, %s965_s25   ;;  %s965_s25 = sphi %s1017_s25, %s22_s25   ;;  %s961_s24 = sphi %s1015_s24, %s1247_s24   ;;  %s957_s23 = sphi %s1013_s23, %s1246_s23   ;;  %s953_s22 = sphi %s1011_s22, %s1245_s22   ;;  %s949_s21 = sphi %s1009_s21, %s1244_s21   ;;  %s945_s20 = sphi %s1007_s20, %s1243_s20  }
   0x9   : > { %s34_s27 = sadd.s32 1, %s961_s24  ;;  %s43_s28 = sadd.s32 1, %s953_s22 }
   0xa   : > { %p36_p0 = scmp.ge.s32.totalorder %s34_s27, 2  ;;  %p50_p1 = scmp.ne.s32.totalorder %s953_s22, %s949_s21 }
   0xb   : > { %p51_p2 = scmp.eq.s32.totalorder %s965_s25, 0  ;;  %p56_p3 = scmp.ne.s32.totalorder %s949_s21, %s945_s20 }
   0xc   : > { %s1249_s27 = smov (%p36_p0, %s34_s27), 0  ;;  %p57_p5 = scmp.eq.s32.totalorder %s694_s4, 0 }
   0xd   : > { %p1048_p4 = por %p51_p2, %p50_p1  ;;  %s38_s30 = ssub.s32 %s961_s24, %s1249_s27 }
   0xe   : > { %p164_p6 = scmp.eq.s32.totalorder %s694_s4, 1  ;;  %p41_p7 = scmp.eq.s32.totalorder %s38_s30, 0 }
   0xf   : > { %p1054_p8 = por %p57_p5, %p56_p3  ;;  %p170_p10 = scmp.eq.s32.totalorder %s695_s26, 1 }
  0x10   : > { %p1058_p9 = por %p164_p6, %p50_p1  ;;  %p792_p13 = scmp.lt.s32.totalorder %s965_s25, 2 }
  0x11   : > { %s1063_s8 = scalar_select %p41_p7, %s953_s22, %s43_s28  }
  0x12   : > { %p1065_p11 = por %p170_p10, %p56_p3  ;;  %s202_s10 = sand.u32 1, %s953_s22  }
  0x13   : > { %s698_s11 = sshll.u32 %s202_s10, 6  ;;  %s724_s12 = sshll.u32 %s961_s24, 10 }
  0x14   : > { %s213_s15 = scalar_lea.hbm %s1231_s0, %s724_s12  ;;  %s206_s16 = scalar_lea.vmem [#allocation4], %s698_s11 }
  0x15   : > { %s214_s17 = sshll.u32 %s206_s16, 4  ;;  %p1078_p0 = pnand %p792_p13, %p1048_p4  ;;  %s215_s17 = int_to_ptr.vmem [resolvable:$true] %s214_s17 }
  0x16   : > { %p701_p1 = scmp.ge.s32.totalorder %s965_s25, 1  ;;  %s203_s19 = scalar_lea.sflag [#allocation5], %s202_s10 }
  0x17   : > { %p859_p2 = pneg %p1078_p0  ;;  %s870_s4 = scalar_lea.vmem %s215_s17, 1024 }
  0x18   : > { %p871_p3 = scmp.ne.s32.totalorder %s215_s17, %s870_s4  ;;  %s967_s26 = smov [#allocation4]  }
  0x19   : > { %s875_s28 = sshll.u32 %s967_s26, 4  ;;  %s876_s28 = int_to_ptr.vmem [resolvable:$false] %s875_s28 }
  0x1a   : > { %p873_p5 = pnand %p871_p3, %p859_p2  ;;  %s877_s30 = scalar_lea.vmem %s876_s28, 2048 }
  0x1b   : > { %p878_p7 = scmp.lt.s32.totalorder %s215_s17, %s876_s28  ;;  %p879_p10 = scmp.lt.s32.totalorder %s877_s30, %s870_s4 }
  0x1c   : > { %p874_p6 = pneg %p873_p5 }
  0x1d   : > { %p880_p12 = por %p879_p10, %p878_p7 }
  0x1f   : > { %p881_p4 = pnand %p880_p12, %p874_p6 }
  0x21   : > { %884 = shalt.err (!%p881_p4)
}
  0x22   : > { %s968_s29 = smov 128   ;;  %s969_s10 = smov 8  }
  0x23   : > { %787 = dma.hbm_to_vmem [thread:$0]  (!%p1078_p0), %s213_s15, 1024, %s215_s17, %s203_s19, %s968_s29, %s968_s29, %s969_s10  }
  0x24   : > { %p222_p13 = scmp.lt.s32.totalorder %s965_s25, 3 }
  0x26   : > { %p223_p2 = pnand %p701_p1, %p222_p13 }
  0x27   : > { %s1091_s11 = sand.u32 (!%p223_p2), 1, %s949_s21  }
  0x28   : > { %226 = sbr.rel (%p223_p2) target bundleno = 517 (0x205), region = 40  ;;  %s702_s12 = sshll.u32 (!%p223_p2), %s1091_s11, 6 }
  0x29   : > { %s229_s13 = scalar_lea.sflag (!%p223_p2), [#allocation5], %s1091_s11  ;;  %s1097_s14 = scalar_lea.vmem (!%p223_p2), [#allocation4], %s702_s12 }
  0x2d   : > { %936 = dma.done.wait (%p1054_p8), %s229_s13, 1024  }
  0x2e   : > { %938 = vsyncadd (%p1054_p8), %s229_s13, 4294966272  ;;  %vm266_vm0 = vcmask 261120   ;;  %v970_v0 = vmov 0.0   ;;  %v847_v1 = vld [vmem:[%s1232_s1 + $0x38] sm:$0xff]   ;;  %v848_v2 = vld [vmem:[%s1232_s1 + $0x30] sm:$0xff]   ;;  %s1166_s30 = scalar_lea.vmem [#allocation7], %s702_s12 }
  0x2f   : > { %269 = vst.msk [vmem:[#allocation2 + $0x10] sm:$0xff] %vm266_vm0, %v970_v0  ;;  %267 = vst.msk [vmem:[#allocation2] sm:$0xff] %vm266_vm0, %v970_v0  ;;  %744 = vmatprep.subr.bf16.mxu0 %v847_v1  ;;  %v849_v3 = vld [vmem:[%s1232_s1 + $0x28] sm:$0xff]   ;;  %v850_v4 = vld [vmem:[%s1232_s1 + $0x20] sm:$0xff]   ;;  %s609_s12 = sshll.u32 %s1166_s30, 4  ;;  %s725_s29 = sshll.u32 %s957_s23, 10  ;;  %s1175_s12 = int_to_ptr.vmem [resolvable:$true] %s609_s12 }
  0x30   : > { %268 = vst.msk [vmem:[#allocation2 + $0x8] sm:$0xff] %vm266_vm0, %v970_v0  ;;  %270 = vst.msk [vmem:[#allocation2 + $0x18] sm:$0xff] %vm266_vm0, %v970_v0  ;;  %745 = vmatpush3.bf16.msra.mxu0 %v847_v1  ;;  %v296_v5 = vld [vmem:[%s1097_s14] sm:$0xff]  ;;  %v297_v6 = vld [vmem:[%s1097_s14 + $0x8] sm:$0xff]  ;;  %s1181_s6 = scalar_lea.hbm %s1236_s5, %s725_s29  ;;  %s596_s23 = scalar_lea.sflag [#allocation6], %s1091_s11 }
  0x31   : > { %271 = vst.msk [vmem:[#allocation2 + $0x20] sm:$0xff] %vm266_vm0, %v970_v0  ;;  %272 = vst.msk [vmem:[#allocation2 + $0x28] sm:$0xff] %vm266_vm0, %v970_v0  ;;  %746 = vmatprep.subr.bf16.mxu0 %v848_v2  ;;  %v304_v7 = vpack.c.bf16 %v297_v6, %v296_v5  ;;  %v851_v8 = vld [vmem:[%s1232_s1 + $0x18] sm:$0xff]   ;;  %v852_v9 = vld [vmem:[%s1232_s1 + $0x10] sm:$0xff]   ;;  %s885_s15 = scalar_lea.vmem %s1175_s12, 1024  ;;  %s971_s16 = smov [#allocation7]  }
  0x32   : > { %273 = vst.msk [vmem:[#allocation2 + $0x30] sm:$0xff] %vm266_vm0, %v970_v0  ;;  %274 = vst.msk [vmem:[#allocation2 + $0x38] sm:$0xff] %vm266_vm0, %v970_v0  ;;  %v853_v10 = vld [vmem:[%s1232_s1 + $0x8] sm:$0xff]   ;;  %v854_v11 = vld [vmem:[%s1232_s1] sm:$0xff]   ;;  %p886_p8 = scmp.ne.s32.totalorder %s1175_s12, %s885_s15  ;;  %s889_s17 = sshll.u32 %s971_s16, 4  ;;  %s890_s17 = int_to_ptr.vmem [resolvable:$false] %s889_s17 }
  0x33   : > { %760 = vmatprep.mubr.bf16.mxu0 %v304_v7  ;;  %v298_v12 = vld [vmem:[%s1097_s14 + $0x10] sm:$0xff]  ;;  %v299_v13 = vld [vmem:[%s1097_s14 + $0x18] sm:$0xff]  ;;  %v300_v14 = vld [vmem:[%s1097_s14 + $0x20] sm:$0xff]  ;;  %s891_s18 = scalar_lea.vmem %s890_s17, 2048  ;;  %p892_p1 = scmp.lt.s32.totalorder %s1175_s12, %s890_s17 }
  0x34   : > { %747 = vmatpush3.bf16.msra.mxu0 %v848_v2  ;;  %v301_v15 = vld [vmem:[%s1097_s14 + $0x28] sm:$0xff]  ;;  %v305_v16 = vpack.c.bf16 %v299_v13, %v298_v12  ;;  %v302_v18 = vld [vmem:[%s1097_s14 + $0x30] sm:$0xff]  ;;  %v303_v19 = vld [vmem:[%s1097_s14 + $0x38] sm:$0xff]  ;;  %s561_s14 = sld [smem:[#allocation3]]  ;;  %p887_p12 = pnand %p886_p8, %p1058_p9 }
  0x35   : > { %748 = vmatprep.subr.bf16.mxu0 %v849_v3  ;;  %v306_v17 = vpack.c.bf16 %v301_v15, %v300_v14  ;;  %v307_v20 = vpack.c.bf16 %v303_v19, %v302_v18  ;;  %v855_v21 = vld [vmem:[%s1233_s2 + $0x8] sm:$0xff]   ;;  %v856_v22 = vld [vmem:[%s1233_s2] sm:$0xff]   ;;  %p893_p3 = scmp.lt.s32.totalorder %s891_s18, %s885_s15 }
  0x36   : > { %768 = vmatprep.subr.bf16.mxu1 %v855_v21  ;;  %v310_v23 = vld [vmem:[#allocation2 + $0x10] sm:$0xff]  ;;  %v308_v25 = vld [vmem:[#allocation2] sm:$0xff]  ;;  %p888_p0 = pneg %p887_p12 }
  0x37   : > { %769 = vmatpush3.bf16.msra.mxu1 %v855_v21  ;;  %v311_v28 = vld [vmem:[#allocation2 + $0x18] sm:$0xff]  ;;  %v309_v31 = vld [vmem:[#allocation2 + $0x8] sm:$0xff]  ;;  %v712_v59 = vld [vmem:[%s1234_s3] ss:$0 sm:$0xff]  ;;  %p894_p5 = por %p893_p3, %p892_p1 }
  0x38   : > { %749 = vmatpush3.bf16.msra.mxu0 %v849_v3  ;;  %770 = vmatprep.subr.bf16.mxu1 %v856_v22  ;;  %v312_v37 = vld [vmem:[#allocation2 + $0x20] sm:$0xff]  ;;  %v313_v43 = vld [vmem:[#allocation2 + $0x28] sm:$0xff] }
  0x39   : > { %750 = vmatprep.subr.bf16.mxu0 %v850_v4  ;;  %v314_v34 = vld [vmem:[#allocation2 + $0x30] sm:$0xff]  ;;  %v315_v40 = vld [vmem:[#allocation2 + $0x38] sm:$0xff]  ;;  %p895_p6 = pnand %p894_p5, %p888_p0 }
  0x3a   : > { %v570_v61 = vstv %s561_s14 }
  0x3b   : > { %771 = vmatpush3.bf16.msra.mxu1 %v856_v22 }
  0x3c   : > { %751 = vmatpush3.bf16.msra.mxu0 %v850_v4 }
  0x3d   : > { %752 = vmatprep.subr.bf16.mxu0 %v851_v8 }
  0x40   : > { %753 = vmatpush3.bf16.msra.mxu0 %v851_v8 }
  0x41   : > { %754 = vmatprep.subr.bf16.mxu0 %v852_v9 }
  0x44   : > { %755 = vmatpush3.bf16.msra.mxu0 %v852_v9 }
  0x45   : > { %756 = vmatprep.subr.bf16.mxu0 %v853_v10 }
  0x48   : > { %757 = vmatpush3.bf16.msra.mxu0 %v853_v10 }
  0x49   : > { %758 = vmatprep.subr.bf16.mxu0 %v854_v11 }
  0x4c   : > { %759 = vmatpush3.bf16.msra.mxu0 %v854_v11 }
  0x4f   : > { %761 = vmatmul.mubr.bf16.vlgmr.msra.gmra.mxu0 %v305_v16 }
  0x50   : > { %764 = vmatprep.mubr.bf16.mxu0 %v306_v17 }
  0x57   : > { %765 = vmatmul.mubr.bf16.gmra.mxu0 %v307_v20 }
 0x10f   : > { %v762_v24 = vpop.f32.mrf.mxu0 }
 0x110   : > { %v431_v26 = vadd.f32 %v762_v24, %v310_v23 }
 0x111   : > { %v398_v27 = vpop.f32.mrf.mxu0 }
 0x112   : > { %440 = vst.msk [vmem:[#allocation2 + $0x10] sm:$0xff] %vm266_vm0, %v431_v26  ;;  %v429_v29 = vadd.f32 %v398_v27, %v308_v25 }
 0x113   : > { %v763_v30 = vpop.f32.mrf.mxu0 }
 0x114   : > { %438 = vst.msk [vmem:[#allocation2] sm:$0xff] %vm266_vm0, %v429_v29  ;;  %v432_v32 = vadd.f32 %v763_v30, %v311_v28 }
 0x115   : > { %v401_v33 = vpop.f32.mrf.mxu0 }
 0x116   : > { %441 = vst.msk [vmem:[#allocation2 + $0x18] sm:$0xff] %vm266_vm0, %v432_v32  ;;  %v430_v35 = vadd.f32 %v401_v33, %v309_v31 }
 0x117   : > { %v766_v36 = vpop.f32.mrf.mxu0 }
 0x118   : > { %439 = vst.msk [vmem:[#allocation2 + $0x8] sm:$0xff] %vm266_vm0, %v430_v35  ;;  %v435_v38 = vadd.f32 %v766_v36, %v314_v34 }
 0x119   : > { %v414_v39 = vpop.f32.mrf.mxu0  ;;  %v451_v51 = vld [vmem:[#allocation2 + $0x10] sm:$0xff] }
 0x11a   : > { %444 = vst.msk [vmem:[#allocation2 + $0x30] sm:$0xff] %vm266_vm0, %v435_v38  ;;  %v433_v41 = vadd.f32 %v414_v39, %v312_v37 }
 0x11b   : > { %v767_v42 = vpop.f32.mrf.mxu0  ;;  %v449_v48 = vld [vmem:[#allocation2] sm:$0xff] }
 0x11c   : > { %442 = vst.msk [vmem:[#allocation2 + $0x20] sm:$0xff] %vm266_vm0, %v433_v41  ;;  %v436_v44 = vadd.f32 %v767_v42, %v315_v40 }
 0x11d   : > { %v417_v45 = vpop.f32.mrf.mxu0  ;;  %v452_v47 = vld [vmem:[#allocation2 + $0x18] sm:$0xff] }
 0x11e   : > { %445 = vst.msk [vmem:[#allocation2 + $0x38] sm:$0xff] %vm266_vm0, %v436_v44  ;;  %v434_v46 = vadd.f32 %v417_v45, %v313_v43  ;;  %v458_v52 = vpack.c.bf16 %v452_v47, %v451_v51 }
 0x11f   : > { %v450_v49 = vld [vmem:[#allocation2 + $0x8] sm:$0xff] }
 0x120   : > { %443 = vst.msk [vmem:[#allocation2 + $0x28] sm:$0xff] %vm266_vm0, %v434_v46  ;;  %v457_v50 = vpack.c.bf16 %v450_v49, %v449_v48 }
 0x121   : > { %v455_v57 = vld [vmem:[#allocation2 + $0x30] sm:$0xff] }
 0x122   : > { %772 = vmatprep.mubr.msk.bf16.mxu1 %vm266_vm0, %v457_v50 }
 0x123   : > { %773 = vmatmul.mubr.msk.bf16.vlgmr.msra.gmra.mxu1 %vm266_vm0, %v458_v52  ;;  %v453_v54 = vld [vmem:[#allocation2 + $0x20] sm:$0xff] }
 0x125   : > { %v456_v53 = vld [vmem:[#allocation2 + $0x38] sm:$0xff] }
 0x126   : > { %v460_v58 = vpack.c.bf16 %v456_v53, %v455_v57 }
 0x127   : > { %v454_v55 = vld [vmem:[#allocation2 + $0x28] sm:$0xff] }
 0x128   : > { %v459_v56 = vpack.c.bf16 %v454_v55, %v453_v54 }
 0x12a   : > { %776 = vmatprep.mubr.msk.bf16.mxu1 %vm266_vm0, %v459_v56 }
 0x12b   : > { %777 = vmatmul.mubr.msk.bf16.gmra.mxu1 %vm266_vm0, %v460_v58 }
 0x1e3   : > { %v774_v60 = vpop.f32.mrf.mxu1 }
 0x1e4   : > { %v539_v62 = vadd.f32 %v774_v60, %v712_v59 }
 0x1e5   : > { %v530_v63 = vpop.f32.mrf.mxu1 }
 0x1e6   : > { %vm564_vm1 = vcmp.gt.f32.partialorder %v539_v62, 0.0  ;;  %v573_v0 = vmul.f32 %v570_v61, %v539_v62  ;;  %v531_v1 = vadd.f32 %v712_v59, %v530_v63 }
 0x1e7   : > { %v775_v2 = vpop.f32.mrf.mxu1 }
 0x1e8   : > { %v581_v3 = vsel %vm564_vm1, %v539_v62, %v573_v0  ;;  %vm562_vm2 = vcmp.gt.f32.partialorder %v531_v1, 0.0  ;;  %v571_v4 = vmul.f32 %v570_v61, %v531_v1  ;;  %v542_v5 = vadd.f32 %v775_v2, %v712_v59 }
 0x1e9   : > { %589 = vst [vmem:[%s1166_s30 + $0x10] sm:$0xff] %v581_v3  ;;  %v533_v6 = vpop.f32.mrf.mxu1 }
 0x1ea   : > { %v579_v7 = vsel %vm562_vm2, %v531_v1, %v571_v4  ;;  %vm565_vm3 = vcmp.gt.f32.partialorder %v542_v5, 0.0  ;;  %v574_v8 = vmul.f32 %v570_v61, %v542_v5  ;;  %v534_v9 = vadd.f32 %v712_v59, %v533_v6 }
 0x1eb   : > { %587 = vst [vmem:[%s1166_s30] sm:$0xff] %v579_v7  ;;  %v778_v10 = vpop.f32.mrf.mxu1 }
 0x1ec   : > { %v582_v11 = vsel %vm565_vm3, %v542_v5, %v574_v8  ;;  %vm563_vm4 = vcmp.gt.f32.partialorder %v534_v9, 0.0  ;;  %v572_v12 = vmul.f32 %v570_v61, %v534_v9  ;;  %v555_v13 = vadd.f32 %v778_v10, %v712_v59 }
 0x1ed   : > { %590 = vst [vmem:[%s1166_s30 + $0x18] sm:$0xff] %v582_v11  ;;  %v546_v14 = vpop.f32.mrf.mxu1 }
 0x1ee   : > { %v580_v15 = vsel %vm563_vm4, %v534_v9, %v572_v12  ;;  %vm568_vm5 = vcmp.gt.f32.partialorder %v555_v13, 0.0  ;;  %v577_v16 = vmul.f32 %v570_v61, %v555_v13  ;;  %v547_v17 = vadd.f32 %v712_v59, %v546_v14 }
 0x1ef   : > { %588 = vst [vmem:[%s1166_s30 + $0x8] sm:$0xff] %v580_v15  ;;  %v779_v18 = vpop.f32.mrf.mxu1 }
 0x1f0   : > { %v585_v19 = vsel %vm568_vm5, %v555_v13, %v577_v16  ;;  %vm566_vm6 = vcmp.gt.f32.partialorder %v547_v17, 0.0  ;;  %v575_v20 = vmul.f32 %v570_v61, %v547_v17  ;;  %v558_v21 = vadd.f32 %v779_v18, %v712_v59 }
 0x1f1   : > { %593 = vst [vmem:[%s1166_s30 + $0x30] sm:$0xff] %v585_v19  ;;  %v549_v22 = vpop.f32.mrf.mxu1 }
 0x1f2   : > { %v583_v23 = vsel %vm566_vm6, %v547_v17, %v575_v20  ;;  %vm569_vm7 = vcmp.gt.f32.partialorder %v558_v21, 0.0  ;;  %v578_v24 = vmul.f32 %v570_v61, %v558_v21  ;;  %v550_v25 = vadd.f32 %v712_v59, %v549_v22 }
 0x1f3   : > { %591 = vst [vmem:[%s1166_s30 + $0x20] sm:$0xff] %v583_v23 }
 0x1f4   : > { %v586_v26 = vsel %vm569_vm7, %v558_v21, %v578_v24  ;;  %vm567_vm8 = vcmp.gt.f32.partialorder %v550_v25, 0.0  ;;  %v576_v27 = vmul.f32 %v570_v61, %v550_v25 }
 0x1f5   : > { %594 = vst [vmem:[%s1166_s30 + $0x38] sm:$0xff] %v586_v26 }
 0x1f6   : > { %v584_v28 = vsel %vm567_vm8, %v550_v25, %v576_v27 }
 0x1f7   : > { %592 = vst [vmem:[%s1166_s30 + $0x28] sm:$0xff] %v584_v28 }
 0x1f8   : > { %898 = shalt.err (!%p895_p6)
}
 0x1f9   : > { %s899_s19 = scalar_lea.hbm %s1181_s6, 1024  ;;  %s903_s26 = scalar_lea.hbm %s1236_s5, 2048 }
 0x1fa   : > { %p900_p7 = scmp.ne.s32.totalorder %s1181_s6, %s899_s19  ;;  %p904_p13 = scmp.lt.s32.totalorder %s1181_s6, %s1236_s5 }
 0x1fb   : > { %p905_p2 = scmp.lt.s32.totalorder %s903_s26, %s899_s19 }
 0x1fc   : > { %p901_p10 = pnand %p900_p7, %p1058_p9 }
 0x1fd   : > { %p906_p8 = por %p905_p2, %p904_p13 }
 0x1fe   : > { %p902_p4 = pneg %p901_p10 }
 0x200   : > { %p907_p12 = pnand %p906_p8, %p902_p4 }
 0x202   : > { %910 = shalt.err (!%p907_p12)
}
 0x203   : > { %s972_s29 = smov 128   ;;  %s973_s10 = smov 8  }
 0x204   : > { %782 = dma.vmem_to_hbm [thread:$0]  (%p1058_p9), %s1175_s12, 1024, %s1181_s6, %s596_s23, %s972_s29, %s972_s29, %s973_s10  }
 0x205 PF: > { %s624_s13 = sand.u32 1, %s945_s20   ;;  %p1242_p0 = scmp.ge.s32.totalorder %s965_s25, 2 }
 0x206   : > { %s625_s15 = scalar_lea.sflag [#allocation6], %s624_s13 }
 0x207   : > { %p789_p1 = pnand %p1242_p0, %p1065_p11 }
 0x209   : > { %p790_p3 = pneg %p789_p1 }
 0x20b   : > { %940 = dma.done.wait (%p790_p3), %s625_s15, 1024  }
 0x20c   : > { %942 = vsyncadd (%p790_p3), %s625_s15, 4294966272  ;;  %s22_s25 = sadd.s32 1, %s965_s25   ;;  %s1243_s20 = smov %s949_s21 }
 0x20d   : > { %p19_p5 = scmp.ge.s32.totalorder %s22_s25, 4   ;;  %s1244_s21 = smov %s953_s22 }
 0x20e   : > { %s1245_s22 = smov %s1063_s8  ;;  %s1246_s23 = smov %s961_s24 }
 0x20f   : > { %s1247_s24 = smov %s1249_s27  ;;  %21 = sbr.rel (!%p19_p5) target bundleno = 8 (0x8), region = 94 }
 0x214   :  { %630 = vsyncpa [#allocation5], 1 }
 0x215   :  { %632 = vsyncpa [#allocation5 + $0x1], 1 }
 0x216   :  { %633 = vsyncpa [#allocation6], 1 }
 0x217   :  { %635 = vsyncpa [#allocation6 + $0x1], 1 }

</bundles_post_ra>
